<compile_context>
chip_gen: v7x
topology: tpu7x:2x2x1
jax: 0.10.0
libtpu: 0.0.40
codegen_flags: <defaults>
</compile_context>

<pallas_src>
import jax
import jax.numpy as jnp
from jax.experimental import pallas as pl
from jax.experimental.pallas import tpu as pltpu

KH = KW = 3  # fixed 3x3 kernel, padding = 1, stride = 1


def _condconv_kernel(p_ref, rw_ref, rb_ref, ew_ref, b_ref, o_ref):
    # p_ref : (Bt, 9*C_in, H*W)     lane-dense im2col patches (row = k*C_in + c)
    # rw_ref: (E, C_in)             routing fc weight
    # rb_ref: (E, 1)                routing fc bias
    # ew_ref: (E, C_out, 9*C_in)    expert conv weights (cols match patch rows)
    # b_ref : (C_out, 1)            conv bias
    # o_ref : (Bt, C_out, H*W)      lane-dense output slab
    Bt = o_ref.shape[0]
    HW = o_ref.shape[2]
    E, C_in = rw_ref.shape
    inv_hw = 1.0 / HW

    for s in range(Bt):  # static unrolled loop over fused samples
        patches = p_ref[s]                                  # (9*C_in, HW)

        # --- routing: global average pool -> linear -> sigmoid ---------------
        # The center 3x3 offset (kh=kw=1) rows of the patch slab are exactly
        # the unshifted input channels.
        # TODO(synk): routing dropout (p=0.2) omitted -> eval-mode semantics.
        xc = patches[4 * C_in:5 * C_in, :]                  # (C_in, HW)
        pooled = jnp.sum(xc, axis=1, keepdims=True) * inv_hw            # (C_in, 1)
        logits = jnp.sum(rw_ref[...] * pooled.T, axis=1, keepdims=True) # (E, 1)
        logits = logits + rb_ref[...]
        r = jax.nn.sigmoid(logits)                                       # (E, 1)

        # --- mix expert kernels (E is tiny; negligible vs. the conv matmul) --
        w_mixed = jnp.sum(r[:, :, None] * ew_ref[...], axis=0)          # (C_out, 9*C_in)

        # --- conv2d (stride 1, pad 1) as one MXU matmul over the im2col slab -
        acc = jnp.dot(w_mixed, patches,
                      preferred_element_type=jnp.float32)               # (C_out, HW)
        o_ref[s] = (acc + b_ref[...]).astype(o_ref.dtype)


def condconv2d(x, route_w, route_b, expert_w, bias, *, batch_tile=None):
    """x: (B, C_in, H, W) NCHW; expert_w: (E, C_out, C_in, 3, 3)."""
    B, C_in, H, W = x.shape
    E, C_out = expert_w.shape[0], expert_w.shape[1]
    HW = H * W

    if batch_tile is None:
        # Fuse samples per grid step to amortize per-step pipeline overhead,
        # but keep >= 2 grid steps so both v7x TensorCores get work.
        batch_tile = 1
        for bt in (8, 4, 2):
            if B % bt == 0 and (B // bt) >= 2:
                batch_tile = bt
                break
    assert B % batch_tile == 0, (B, batch_tile)

    # im2col in the wrapper (layout plumbing): lane-dense (B, 9*C_in, H*W),
    # patch-row order = (kh*3 + kw) * C_in + c.
    xp = jnp.pad(x, ((0, 0), (0, 0), (1, 1), (1, 1)))                    # pad=1
    cols = [xp[:, :, kh:kh + H, kw:kw + W] for kh in range(KH) for kw in range(KW)]
    patches = jnp.stack(cols, axis=1).reshape(B, KH * KW * C_in, HW)

    # Reorder expert kernels so their columns match the patch-row order.
    ew = jnp.transpose(expert_w, (0, 1, 3, 4, 2)).reshape(E, C_out, KH * KW * C_in)
    rb2 = route_b.reshape(E, 1)
    b2 = bias.reshape(C_out, 1)

    out_flat = pl.pallas_call(
        _condconv_kernel,
        out_shape=jax.ShapeDtypeStruct((B, C_out, HW), x.dtype),
        grid_spec=pltpu.PrefetchScalarGridSpec(
            num_scalar_prefetch=0,
            grid=(B // batch_tile,),
            in_specs=[
                pl.BlockSpec((batch_tile, KH * KW * C_in, HW), lambda b: (b, 0, 0)),
                pl.BlockSpec((E, C_in), lambda b: (0, 0)),
                pl.BlockSpec((E, 1), lambda b: (0, 0)),
                pl.BlockSpec((E, C_out, KH * KW * C_in), lambda b: (0, 0, 0)),
                pl.BlockSpec((C_out, 1), lambda b: (0, 0)),
            ],
            out_specs=pl.BlockSpec((batch_tile, C_out, HW), lambda b: (b, 0, 0)),
        ),
        compiler_params=pltpu.CompilerParams(
            dimension_semantics=("parallel",)),
    )(patches, route_w, rb2, ew, b2)

    return out_flat.reshape(B, C_out, H, W)


def reference(x, route_w, route_b, expert_w, bias):
    """Pure-JAX reference mirroring the PyTorch per-sample loop."""
    outs = []
    for i in range(x.shape[0]):
        xi = x[i:i + 1]
        pooled = jnp.mean(xi[0], axis=(1, 2))                              # (C_in,)
        r = jax.nn.sigmoid(route_w @ pooled + route_b)                     # (E,)
        w = jnp.sum(r[:, None, None, None, None] * expert_w, axis=0)       # (C_out,C_in,3,3)
        out = jax.lax.conv_general_dilated(
            xi, w, window_strides=(1, 1), padding=((1, 1), (1, 1)),
            dimension_numbers=("NCHW", "OIHW", "NCHW"))
        outs.append(out + bias[None, :, None, None])
    return jnp.concatenate(outs, axis=0)


if __name__ == "__main__":
    B, C_in, H, W = 2, 1, 16, 16          # in_channels=1 per the module
    C_out, E = 32, 4                      # out_channels=32, num_experts=4

    key = jax.random.PRNGKey(0)
    k1, k2, k3, k4, k5 = jax.random.split(key, 5)
    x = jax.random.normal(k1, (B, C_in, H, W), jnp.float32)
    expert_w = 0.1 * jax.random.normal(k2, (E, C_out, C_in, KH, KW), jnp.float32)
    bias = 0.1 * jax.random.normal(k3, (C_out,), jnp.float32)
    route_w = 0.1 * jax.random.normal(k4, (E, C_in), jnp.float32)
    route_b = 0.1 * jax.random.normal(k5, (E,), jnp.float32)

    out = condconv2d(x, route_w, route_b, expert_w, bias)
    out = jax.block_until_ready(out)

    ref = reference(x, route_w, route_b, expert_w, bias)
    assert out.shape == (B, C_out, H, W), out.shape
    assert jnp.allclose(out, ref, atol=1e-4, rtol=1e-4), \
        float(jnp.max(jnp.abs(out - ref)))
    print("KERNEL_OK")
</pallas_src>

<mosaic_0001>
module attributes {stable_mosaic.version = 11 : i64} {
  func.func @_condconv_kernel(%arg0: i32, %arg1: memref<1x9x256xf32, #tpu.memory_space<vmem>>, %arg2: memref<4x1xf32, #tpu.memory_space<vmem>>, %arg3: memref<4x1xf32, #tpu.memory_space<vmem>>, %arg4: memref<4x32x9xf32, #tpu.memory_space<vmem>>, %arg5: memref<32x1xf32, #tpu.memory_space<vmem>>, %arg6: memref<1x32x256xf32, #tpu.memory_space<vmem>>) attributes {dimension_semantics = [#tpu.dimension_semantics<parallel>], iteration_bounds = array<i64: 2>, scalar_prefetch = 0 : i64, scratch_operands = 0 : i64, tpu.core_type = #tpu.core_type<tc>, window_params = [{transform_indices = @transform_0, window_bounds = array<i64: 1, 9, 256>}, {pipeline_mode = #tpu.pipeline_mode<synchronous>, transform_indices = @transform_1, window_bounds = array<i64: 4, 1>}, {pipeline_mode = #tpu.pipeline_mode<synchronous>, transform_indices = @transform_2, window_bounds = array<i64: 4, 1>}, {pipeline_mode = #tpu.pipeline_mode<synchronous>, transform_indices = @transform_3, window_bounds = array<i64: 4, 32, 9>}, {pipeline_mode = #tpu.pipeline_mode<synchronous>, transform_indices = @transform_4, window_bounds = array<i64: 32, 1>}, {transform_indices = @transform_5, window_bounds = array<i64: 1, 32, 256>}]} {
    %c0 = arith.constant 0 : index
    %c0_0 = arith.constant 0 : index
    %c0_1 = arith.constant 0 : index
    %0 = vector.load %arg1[%c0, %c0_0, %c0_1] : memref<1x9x256xf32, #tpu.memory_space<vmem>>, vector<1x9x256xf32>
    %1 = vector.shape_cast %0 : vector<1x9x256xf32> to vector<9x256xf32>
    %2 = vector.extract_strided_slice %1 {offsets = [4, 0], sizes = [1, 256], strides = [1, 1]} : vector<9x256xf32> to vector<1x256xf32>
    %cst = arith.constant dense<0.000000e+00> : vector<1xf32>
    %3 = vector.multi_reduction <add>, %2, %cst [1] : vector<1x256xf32> to vector<1xf32>
    %4 = vector.shape_cast %3 : vector<1xf32> to vector<1x1xf32>
    %cst_2 = arith.constant 3.906250e-03 : f32
    %5 = vector.broadcast %cst_2 : f32 to vector<1x1xf32>
    %6 = arith.mulf %4, %5 : vector<1x1xf32>
    %c0_3 = arith.constant 0 : index
    %c0_4 = arith.constant 0 : index
    %7 = vector.load %arg2[%c0_3, %c0_4] : memref<4x1xf32, #tpu.memory_space<vmem>>, vector<4x1xf32>
    %8 = tpu.transpose %6, [1, 0] : vector<1x1xf32> -> vector<1x1xf32>
    %9 = vector.broadcast %8 : vector<1x1xf32> to vector<4x1xf32>
    %10 = arith.mulf %7, %9 : vector<4x1xf32>
    %cst_5 = arith.constant dense<0.000000e+00> : vector<4xf32>
    %11 = vector.multi_reduction <add>, %10, %cst_5 [1] : vector<4x1xf32> to vector<4xf32>
    %12 = vector.shape_cast %11 : vector<4xf32> to vector<4x1xf32>
    %c0_6 = arith.constant 0 : index
    %c0_7 = arith.constant 0 : index
    %13 = vector.load %arg3[%c0_6, %c0_7] : memref<4x1xf32, #tpu.memory_space<vmem>>, vector<4x1xf32>
    %14 = arith.addf %12, %13 : vector<4x1xf32>
    %15 = arith.negf %14 : vector<4x1xf32>
    %16 = math.exp %15 : vector<4x1xf32>
    %cst_8 = arith.constant 1.000000e+00 : f32
    %17 = vector.broadcast %cst_8 : f32 to vector<4x1xf32>
    %18 = arith.addf %17, %16 : vector<4x1xf32>
    %19 = arith.divf %17, %18 : vector<4x1xf32>
    %20 = vector.shape_cast %19 : vector<4x1xf32> to vector<4x1x1xf32>
    %c0_9 = arith.constant 0 : index
    %c0_10 = arith.constant 0 : index
    %c0_11 = arith.constant 0 : index
    %21 = vector.load %arg4[%c0_9, %c0_10, %c0_11] : memref<4x32x9xf32, #tpu.memory_space<vmem>>, vector<4x32x9xf32>
    %22 = vector.broadcast %20 : vector<4x1x1xf32> to vector<4x32x9xf32>
    %23 = arith.mulf %22, %21 : vector<4x32x9xf32>
    %cst_12 = arith.constant dense<0.000000e+00> : vector<32x9xf32>
    %24 = vector.multi_reduction <add>, %23, %cst_12 [0] : vector<4x32x9xf32> to vector<32x9xf32>
    %cst_13 = arith.constant dense<0.000000e+00> : vector<32x256xf32>
    %25 = tpu.matmul %24, %1, %cst_13 {dimension_numbers = #tpu.dot_dimension_numbers<[1], [0], [0], [1], [0, 0, 1, 1], [], []>} : vector<32x9xf32>, vector<9x256xf32>, vector<32x256xf32> -> vector<32x256xf32>
    %c0_14 = arith.constant 0 : index
    %c0_15 = arith.constant 0 : index
    %26 = vector.load %arg5[%c0_14, %c0_15] : memref<32x1xf32, #tpu.memory_space<vmem>>, vector<32x1xf32>
    %27 = vector.broadcast %26 : vector<32x1xf32> to vector<32x256xf32>
    %28 = arith.addf %25, %27 : vector<32x256xf32>
    %c0_16 = arith.constant 0 : index
    %c0_17 = arith.constant 0 : index
    %c0_18 = arith.constant 0 : index
    %29 = vector.load %arg6[%c0_16, %c0_17, %c0_18] : memref<1x32x256xf32, #tpu.memory_space<vmem>>, vector<1x32x256xf32>
    %30 = vector.shape_cast %29 : vector<1x32x256xf32> to vector<32x256xf32>
    %31 = vector.shape_cast %28 : vector<32x256xf32> to vector<1x32x256xf32>
    tpu.vector_store %arg6[%c0_16, %c0_17, %c0_18], %31 {strides = array<i32>} : memref<1x32x256xf32, #tpu.memory_space<vmem>>, vector<1x32x256xf32>,
    return
  }
  func.func @transform_0(%arg0: i32) -> (i32, i32, i32) {
    %c0_i32 = arith.constant 0 : i32
    %c0_i32_0 = arith.constant 0 : i32
    %c0_i32_1 = arith.constant 0 : i32
    return %arg0, %c0_i32, %c0_i32_0 : i32, i32, i32
  }
  func.func @transform_1(%arg0: i32) -> (i32, i32) {
    %c0_i32 = arith.constant 0 : i32
    %c0_i32_0 = arith.constant 0 : i32
    %c0_i32_1 = arith.constant 0 : i32
    return %c0_i32, %c0_i32_0 : i32, i32
  }
  func.func @transform_2(%arg0: i32) -> (i32, i32) {
    %c0_i32 = arith.constant 0 : i32
    %c0_i32_0 = arith.constant 0 : i32
    %c0_i32_1 = arith.constant 0 : i32
    return %c0_i32, %c0_i32_0 : i32, i32
  }
  func.func @transform_3(%arg0: i32) -> (i32, i32, i32) {
    %c0_i32 = arith.constant 0 : i32
    %c0_i32_0 = arith.constant 0 : i32
    %c0_i32_1 = arith.constant 0 : i32
    %c0_i32_2 = arith.constant 0 : i32
    return %c0_i32, %c0_i32_0, %c0_i32_1 : i32, i32, i32
  }
  func.func @transform_4(%arg0: i32) -> (i32, i32) {
    %c0_i32 = arith.constant 0 : i32
    %c0_i32_0 = arith.constant 0 : i32
    %c0_i32_1 = arith.constant 0 : i32
    return %c0_i32, %c0_i32_0 : i32, i32
  }
  func.func @transform_5(%arg0: i32) -> (i32, i32, i32) {
    %c0_i32 = arith.constant 0 : i32
    %c0_i32_0 = arith.constant 0 : i32
    %c0_i32_1 = arith.constant 0 : i32
    return %arg0, %c0_i32, %c0_i32_0 : i32, i32, i32
  }
}

</mosaic_0001>

<bundles_post_ra>
// kernel: tpu_custom_call.1
= control target key start
LH: loop header
LB: loop body
LE: loop exit
PB: predicated region body
PF: predicated region fallthrough
CT: control target
= control target key end

     0   :  { %10 = vsyncpa [#allocation3], 0  ;;  %s1002_s0 = inlined_call_operand.vmem [shape: f32[2,9,256], index: 0, kind: input, shape index: {}]   ;;  %s1003_s1 = inlined_call_operand.vmem [shape: f32[4,1], index: 1, kind: input, shape index: {}]   ;;  %s1004_s2 = inlined_call_operand.vmem [shape: f32[4,1], index: 2, kind: input, shape index: {}]   ;;  %s1005_s3 = inlined_call_operand.vmem [shape: f32[4,32,9], index: 3, kind: input, shape index: {}]   ;;  %s1006_s4 = inlined_call_operand.vmem [shape: f32[32,1], index: 4, kind: input, shape index: {}]   ;;  %s1007_s5 = inlined_call_operand.hbm [shape: f32[2,32,256], index: 5, kind: output, shape index: {}]  }
   0x1   :  { %12 = vsyncpa [#allocation3 + $0x1], 0  ;;  %s799_s18 = smov 0   ;;  %s801_s19 = smov 0  }
   0x2   :  { %s803_s20 = smov 0   ;;  %s805_s21 = smov 0  }
   0x3 LB: > { %s820_s22 = sadd.s32 4294967295, %s760_s21   ;;  %s618_s23 = sadd.s32 4294967294, %s760_s21   ;;  %s760_s21 = sphi %s805_s21, %s1013_s21   ;;  %s756_s20 = sphi %s803_s20, %s1012_s20   ;;  %s752_s19 = sphi %s801_s19, %s1011_s19   ;;  %s748_s18 = sphi %s799_s18, %s1010_s18  }
   0x4   : > { %s824_s24 = sadd.s32 1, %s760_s21   ;;  %s135_s25 = sadd.s32 1, %s756_s20 }
   0x5   : > { %s132_s26 = ssub.s32 %s760_s21, %s824_s24  ;;  %p145_p0 = scmp.ne.s32.totalorder %s756_s20, %s752_s19 }
   0x6   : > { %p133_p1 = scmp.eq.s32.totalorder %s132_s26, 0  ;;  %p146_p2 = scmp.eq.s32.totalorder %s820_s22, 1 }
   0x7   : > { %p151_p3 = scmp.ne.s32.totalorder %s752_s19, %s748_s18  ;;  %p152_p4 = scmp.eq.s32.totalorder %s618_s23, 1 }
   0x8   : > { %s835_s27 = scalar_select %p133_p1, %s756_s20, %s135_s25  }
   0x9   : > { %p837_p5 = por %p146_p2, %p145_p0  ;;  %p841_p6 = por %p152_p4, %p151_p3 }
   0xa   : > { %p621_p7 = scmp.ge.s32.totalorder %s760_s21, 1  ;;  %p190_p8 = scmp.lt.s32.totalorder %s760_s21, 3 }
   0xc   : > { %p191_p9 = pnand %p621_p7, %p190_p8 }
   0xd   : > { %p218_p10 = scmp.lt.s32.totalorder (!%p191_p9), %s820_s22, 1  ;;  %vm227_vm0 = vcmask (!%p191_p9), 1044484   ;;  %v762_v8 = vmov (!%p191_p9), 0   ;;  %v270_v9 = vlaneseq (!%p191_p9)  ;;  %v234_v12 = vld [vmem:[%s1003_s1] sm:$0xf] (!%p191_p9)  ;;  %vm438_vm1 = vcmask (!%p191_p9), 1040384  }
   0xe   : > { %194 = sbr.rel (%p191_p9) target bundleno = 721 (0x2d1), region = 40  ;;  %692 = vset.pattern.permute.xlu1 (!%p191_p9), %v762_v8  ;;  %v276_v15 = vld [vmem:[%s1004_s2] sm:$0xf] (!%p191_p9)  ;;  %v763_v21 = vmov (!%p191_p9), 1966171168   ;;  %vm764_vm2 = vmmov (!%p191_p9), 1  }
   0xf   : > { %v271_v10 = vshrl.u32 (!%p191_p9), %v270_v9, 7  ;;  %v286_v22 = vunpack.c.l.s4 (!%p191_p9), %v763_v21  ;;  %vm640_vm3 = vmpackc.low (!%p191_p9), %vm438_vm1, %vm764_vm2  ;;  %v402_v40 = vld [vmem:[%s1006_s4] sm:$0xff] (!%p191_p9)  ;;  %v765_v41 = vmov (!%p191_p9), 0.0   ;;  %v403_v42 = vld [vmem:[%s1006_s4 + $0x8] sm:$0xff] (!%p191_p9)  ;;  %vm373_vm4 = vcmask (!%p191_p9), 72704   ;;  %s638_s8 = sshll.u32 (!%p191_p9), %s820_s22, 10 }
  0x10   : > { %509 = vmatprep.mubr.f32.mxu0 (!%p191_p9), %v765_v41  ;;  %521 = vmatprep.mubr.f32.mxu1 (!%p191_p9), %v765_v41  ;;  %v404_v43 = vld [vmem:[%s1006_s4 + $0x10] sm:$0xff] (!%p191_p9)  ;;  %v405_v44 = vld [vmem:[%s1006_s4 + $0x18] sm:$0xff] (!%p191_p9)  ;;  %v313_v46 = vld [vmem:[%s1005_s3 + $0x20] sm:$0xff] (!%p191_p9)  ;;  %s955_s13 = scalar_lea.hbm (!%p191_p9), %s1007_s5, %s638_s8  ;;  %s766_s15 = smov (!%p191_p9), [#allocation2]  }
  0x11   : > { %v272_v11 = vsub.s32 (!%p191_p9), 0, %v271_v10  ;;  %v287_v23 = vunpack.c.0.s8 (!%p191_p9), %v286_v22  ;;  %v315_v47 = vld [vmem:[%s1005_s3 + $0x30] sm:$0xff] (!%p191_p9)  ;;  %v309_v48 = vld [vmem:[%s1005_s3] sm:$0xff] (!%p191_p9)  ;;  %v314_v51 = vld [vmem:[%s1005_s3 + $0x28] sm:$0xff] (!%p191_p9)  ;;  %s702_s16 = sshll.u32 (!%p191_p9), %s766_s15, 4  ;;  %s703_s16 = int_to_ptr.vmem [resolvable:$false] %s702_s16 }
  0x12   : > { %v311_v49 = vld [vmem:[%s1005_s3 + $0x10] sm:$0xff] (!%p191_p9)  ;;  %v316_v52 = vld [vmem:[%s1005_s3 + $0x38] sm:$0xff] (!%p191_p9)  ;;  %v317_v57 = vld [vmem:[%s1005_s3 + $0x40] sm:$0xff] (!%p191_p9)  ;;  %s704_s17 = scalar_lea.vmem (!%p191_p9), %s703_s16, 2048 }
  0x13   : > { %v290_v24 = vsub.s32 (!%p191_p9), %v287_v23, %v271_v10  ;;  %v319_v58 = vld [vmem:[%s1005_s3 + $0x50] sm:$0xff] (!%p191_p9)  ;;  %v310_v59 = vld [vmem:[%s1005_s3 + $0x8] sm:$0xff] (!%p191_p9)  ;;  %v312_v60 = vld [vmem:[%s1005_s3 + $0x18] sm:$0xff] (!%p191_p9) }
  0x14   : > { %v318_v63 = vld [vmem:[%s1005_s3 + $0x48] sm:$0xff] (!%p191_p9) }
  0x15   : > { %s219_s30 = scalar_select %p218_p10, %s820_s22, 1 }
  0x17   : > { %s637_s6 = sshll.u32 %s219_s30, 5 }
  0x18   : > { %s852_s9 = scalar_lea.vmem %s1002_s0, %s637_s6  ;;  %s215_s6 = sand.u32 1, %s752_s19  }
  0x19   : > { %v223_v0 = vld [vmem:[%s852_s9] sm:$0xff]  ;;  %v224_v1 = vld [vmem:[%s852_s9 + $0x8] sm:$0xff]  ;;  %v225_v35 = vld [vmem:[%s852_s9 + $0x10] sm:$0x1]  ;;  %s622_s7 = sshll.u32 %s215_s6, 6  ;;  %s961_s22 = scalar_lea.sflag [#allocation3], %s215_s6 }
  0x1a   : > { %v228_v2 = vsel %vm227_vm0, %v223_v0, 0.0  ;;  %v229_v3 = vsel %vm227_vm0, %v224_v1, 0.0  ;;  %v642_v36 = vpack.c.bf16 %v225_v35, %v223_v0  ;;  %v226_v38 = vld [vmem:[%s852_s9 + $0x18] sm:$0x1]  ;;  %s217_s9 = scalar_lea.vmem [#allocation2], %s622_s7 }
  0x1b   : > { %v230_v4 = vadd.f32 %v229_v3, %v228_v2  ;;  %v639_v39 = vpack.c.bf16 %v226_v38, %v224_v1  ;;  %v320_v0 = vld [vmem:[%s1005_s3 + $0x58] sm:$0xff]  ;;  %s556_s10 = sshll.u32 %s217_s9, 4  ;;  %s957_s10 = int_to_ptr.vmem [resolvable:$true] %s556_s10 }
  0x1c   : > { %s698_s14 = scalar_lea.vmem %s957_s10, 1024  ;;  %p705_p0 = scmp.lt.s32.totalorder %s957_s10, %s703_s16 }
  0x1d   : > { %231 = vadd.xlane.f32.xlu0 %v230_v4  ;;  %641 = vmatprep.subr.msk.bf16.mxu0 %vm640_vm3, %v639_v39  ;;  %p699_p11 = scmp.ne.s32.totalorder %s957_s10, %s698_s14  ;;  %p706_p1 = scmp.lt.s32.totalorder %s704_s17, %s698_s14 }
  0x1e   : > { %645 = vmatprep.subr.msk.bf16.mxu1 %vm640_vm3, %v639_v39  ;;  %644 = vmatpush1.bf16.msk.msra.mxu0 %vm640_vm3, %v642_v36 }
  0x1f   : > { %646 = vmatpush1.bf16.msk.msra.mxu1 %vm640_vm3, %v642_v36  ;;  %p700_p12 = pnand %p699_p11, %p837_p5  ;;  %p707_p2 = por %p706_p1, %p705_p0 }
  0x21   : > { %p701_p13 = pneg %p700_p12 }
  0x23   : > { %p708_p3 = pnand %p707_p2, %p701_p13 }
  0xaa   : > { %v232_v5 = vpop.xlane.xlu0 %231 }
  0xab   : > { %v233_v6 = vmul.f32 0.00390625, %v232_v5 }
  0xad   : > { %v236_v7 = vrot.slane %v233_v6, 4  ;;  %v321_v6 = vld [vmem:[%s1005_s3 + $0x60] sm:$0xff] }
  0xaf   : > { %238 = vxpose.xlu0.b32.start.end [1/1] (short) (narrow) %v236_v7, 8 }
  0xd8   : > { %693 = vset.pattern.permute.xlu0 %v762_v8 }
 0x12f   : > { %v254_v13 = vpop.trf.xlu0 }
 0x130   : > { %v273_v14 = vrot.slane %v254_v13, %v272_v11  ;;  %v324_v13 = vld [vmem:[%s1005_s3 + $0x78] sm:$0xff] }
 0x132   : > { %v274_v16 = vmul.f32 %v273_v14, %v234_v12  ;;  %v323_v12 = vld [vmem:[%s1005_s3 + $0x70] sm:$0xff] }
 0x134   : > { %v277_v17 = vadd.f32 %v276_v15, %v274_v16 }
 0x136   : > { %v625_v18 = vmul.f32 -1.442695, %v277_v17 }
 0x138   : > { %694 = vpow2.f32 %v625_v18 }
 0x142   : > { %v695_v19 = vpop.eup %694 }
 0x143   : > { %v281_v20 = vadd.f32 1.0, %v695_v19 }
 0x145   : > { %696 = vrcp.f32 %v281_v20 }
 0x14f   : > { %v697_v25 = vpop.eup %696 }
 0x150   : > { %v291_v26 = vrot.slane %v697_v25, %v290_v24 }
 0x152   : > { %v299_v27 = vrot.slane %v291_v26, %v290_v24  ;;  %v292_v28 = vcombine.high %v291_v26, %v291_v26 }
 0x154   : > { %v328_v29 = vrot.slane %v299_v27, %v272_v11  ;;  %v306_v30 = vrot.slane %v292_v28, %v290_v24  ;;  %v307_v31 = vcombine.high %v299_v27, %v299_v27 }
 0x156   : > { %342 = vperm.xlu1 %692, %v328_v29   ;;  %v332_v32 = vrot.slane %v306_v30, %v272_v11  ;;  %v336_v33 = vrot.slane %v307_v31, %v272_v11  ;;  %v308_v34 = vcombine.high %v306_v30, %v306_v30 }
 0x158   : > { %v340_v37 = vrot.slane %v308_v34, %v272_v11  ;;  %v322_v11 = vld [vmem:[%s1005_s3 + $0x68] sm:$0xff] }
 0x15a   : > { %346 = vperm.xlu1 %692, %v332_v32  }
 0x15e   : > { %350 = vperm.xlu1 %692, %v336_v33  }
 0x162   : > { %354 = vperm.xlu1 %692, %v340_v37  }
 0x166   : > { %408 = vperm.xlu1 %692, %v402_v40  }
 0x16a   : > { %413 = vperm.xlu1 %692, %v403_v42  }
 0x16e   : > { %418 = vperm.xlu1 %692, %v404_v43  }
 0x172   : > { %423 = vperm.xlu1 %692, %v405_v44  }
 0x1d5   : > { %v343_v45 = vpop.permute.xlu1 %342 }
 0x1d6   : > { %v357_v55 = vmul.f32 %v343_v45, %v309_v48  ;;  %v359_v56 = vmul.f32 %v343_v45, %v311_v49  ;;  %v358_v7 = vmul.f32 %v343_v45, %v310_v59  ;;  %v360_v8 = vmul.f32 %v343_v45, %v312_v60 }
 0x1d8   : > { %v374_v9 = vsel %vm373_vm4, %v357_v55, 0.0  ;;  %v388_v10 = vsel %vm373_vm4, %v359_v56, 0.0  ;;  %v381_v27 = vsel %vm373_vm4, %v358_v7, 0.0  ;;  %v395_v28 = vsel %vm373_vm4, %v360_v8, 0.0 }
 0x1d9   : > { %v347_v50 = vpop.permute.xlu1 %346 }
 0x1da   : > { %v361_v53 = vmul.f32 %v347_v50, %v313_v46  ;;  %v363_v54 = vmul.f32 %v347_v50, %v315_v47  ;;  %v362_v61 = vmul.f32 %v347_v50, %v314_v51  ;;  %v364_v62 = vmul.f32 %v347_v50, %v316_v52 }
 0x1dc   : > { %v375_v2 = vsel %vm373_vm4, %v361_v53, 0.0  ;;  %v389_v3 = vsel %vm373_vm4, %v363_v54, 0.0  ;;  %v382_v19 = vsel %vm373_vm4, %v362_v61, 0.0  ;;  %v396_v21 = vsel %vm373_vm4, %v364_v62, 0.0 }
 0x1dd   : > { %v351_v1 = vpop.permute.xlu1 %350  ;;  %v376_v18 = vadd.f32 %v375_v2, %v374_v9  ;;  %v390_v20 = vadd.f32 %v389_v3, %v388_v10  ;;  %v383_v35 = vadd.f32 %v382_v19, %v381_v27  ;;  %v397_v36 = vadd.f32 %v396_v21, %v395_v28 }
 0x1de   : > { %v365_v4 = vmul.f32 %v351_v1, %v317_v57  ;;  %v367_v5 = vmul.f32 %v351_v1, %v319_v58  ;;  %v366_v14 = vmul.f32 %v351_v1, %v318_v63  ;;  %v368_v15 = vmul.f32 %v351_v1, %v320_v0 }
 0x1e0   : > { %v377_v16 = vsel %vm373_vm4, %v365_v4, 0.0  ;;  %v391_v17 = vsel %vm373_vm4, %v367_v5, 0.0  ;;  %v384_v31 = vsel %vm373_vm4, %v366_v14, 0.0  ;;  %v398_v32 = vsel %vm373_vm4, %v368_v15, 0.0 }
 0x1e1   : > { %v355_v22 = vpop.permute.xlu1 %354  ;;  %v378_v29 = vadd.f32 %v377_v16, %v376_v18  ;;  %v392_v30 = vadd.f32 %v391_v17, %v390_v20  ;;  %v385_v42 = vadd.f32 %v384_v31, %v383_v35  ;;  %v399_v43 = vadd.f32 %v398_v32, %v397_v36 }
 0x1e2   : > { %v369_v23 = vmul.f32 %v355_v22, %v321_v6  ;;  %v370_v24 = vmul.f32 %v355_v22, %v322_v11  ;;  %v371_v25 = vmul.f32 %v355_v22, %v323_v12  ;;  %v372_v26 = vmul.f32 %v355_v22, %v324_v13 }
 0x1e4   : > { %v379_v33 = vsel %vm373_vm4, %v369_v23, 0.0  ;;  %v393_v34 = vsel %vm373_vm4, %v371_v25, 0.0  ;;  %v386_v39 = vsel %vm373_vm4, %v370_v24, 0.0  ;;  %v400_v40 = vsel %vm373_vm4, %v372_v26, 0.0 }
 0x1e5   : > { %v380_v37 = vadd.f32 %v379_v33, %v378_v29  ;;  %v394_v38 = vadd.f32 %v393_v34, %v392_v30  ;;  %v387_v44 = vadd.f32 %v386_v39, %v385_v42  ;;  %v401_v45 = vadd.f32 %v400_v40, %v399_v43  ;;  %v409_v46 = vpop.permute.xlu1 %408 }
 0x1e7   : > { %628 = vmatmul.mubr.msk.f32.vlgmr.msra.gmra.mrb[0].mxu0 %vm373_vm4, %v380_v37  ;;  %630 = vmatmul.mubr.msk.f32.vlgmr.msra.gmra.mrb[0].mxu1 %vm373_vm4, %v394_v38 }
 0x1e8   : > { %515 = vmatprep.mubr.f32.mxu0 %v765_v41  ;;  %527 = vmatprep.mubr.f32.mxu1 %v765_v41 }
 0x1e9   : > { %v414_v47 = vpop.permute.xlu1 %413 }
 0x1eb   : > { %629 = vmatmul.mubr.msk.f32.gmra.mrb[2].mxu0 %vm373_vm4, %v387_v44  ;;  %631 = vmatmul.mubr.msk.f32.gmra.mrb[2].mxu1 %vm373_vm4, %v401_v45 }
 0x1ed   : > { %v419_v48 = vpop.permute.xlu1 %418 }
 0x1f1   : > { %v424_v56 = vpop.permute.xlu1 %423 }
 0x2ba   : > { %v511_v49 = vpop.f32.mrb[0].mxu0  ;;  %v523_v50 = vpop.f32.mrb[0].mxu1 }
 0x2bb   : > { %v512_v51 = vadd.f32 %v511_v49, %v409_v46  ;;  %v524_v52 = vadd.f32 %v523_v50, %v419_v48  ;;  %v513_v53 = vpop.f32.mrb[1].mxu0  ;;  %v525_v54 = vpop.f32.mrb[1].mxu1 }
 0x2bc   : > { %v514_v41 = vadd.f32 %v513_v53, %v409_v46  ;;  %v526_v55 = vadd.f32 %v525_v54, %v419_v48 }
 0x2bd   : > { %534 = vst [vmem:[%s217_s9] sm:$0xff] %v512_v51  ;;  %538 = vst [vmem:[%s217_s9 + $0x20] sm:$0xff] %v524_v52 }
 0x2be   : > { %535 = vst [vmem:[%s217_s9 + $0x8] sm:$0xff] %v514_v41  ;;  %539 = vst [vmem:[%s217_s9 + $0x28] sm:$0xff] %v526_v55  ;;  %v517_v57 = vpop.f32.mrb[2].mxu0  ;;  %v529_v58 = vpop.f32.mrb[2].mxu1 }
 0x2bf   : > { %v518_v59 = vadd.f32 %v517_v57, %v414_v47  ;;  %v530_v60 = vadd.f32 %v529_v58, %v424_v56  ;;  %v519_v61 = vpop.f32.mrb[3].mxu0  ;;  %v531_v62 = vpop.f32.mrb[3].mxu1 }
 0x2c0   : > { %v520_v63 = vadd.f32 %v519_v61, %v414_v47  ;;  %v532_v0 = vadd.f32 %v531_v62, %v424_v56 }
 0x2c1   : > { %536 = vst [vmem:[%s217_s9 + $0x10] sm:$0xff] %v518_v59  ;;  %540 = vst [vmem:[%s217_s9 + $0x30] sm:$0xff] %v530_v60 }
 0x2c2   : > { %537 = vst [vmem:[%s217_s9 + $0x18] sm:$0xff] %v520_v63  ;;  %541 = vst [vmem:[%s217_s9 + $0x38] sm:$0xff] %v532_v0 }
 0x2c3   : > { %711 = shalt.err (!%p708_p3)
}
 0x2c4   : > { %s712_s23 = scalar_lea.hbm %s955_s13, 1024  ;;  %s716_s30 = scalar_lea.hbm %s1007_s5, 2048 }
 0x2c5   : > { %p713_p4 = scmp.ne.s32.totalorder %s955_s13, %s712_s23  ;;  %p717_p9 = scmp.lt.u32.totalorder %s955_s13, %s1007_s5 }
 0x2c6   : > { %p718_p10 = scmp.lt.u32.totalorder %s716_s30, %s712_s23  ;;  %p720_p12 = scmp.lt.u32.totalorder %s712_s23, %s955_s13 }
 0x2c7   : > { %p714_p7 = pnand %p713_p4, %p837_p5 }
 0x2c8   : > { %p719_p11 = por %p718_p10, %p717_p9 }
 0x2c9   : > { %p715_p8 = pneg %p714_p7 }
 0x2ca   : > { %p721_p13 = por %p720_p12, %p719_p11 }
 0x2cc   : > { %p722_p0 = pnand %p721_p13, %p715_p8 }
 0x2ce   : > { %725 = shalt.err (!%p722_p0)
}
 0x2cf   : > { %s767_s8 = smov 256   ;;  %s768_s9 = smov 16  }
 0x2d0   : > { %647 = dma.vmem_to_hbm [thread:$0]  (%p837_p5), %s957_s10, 1024, %s955_s13, %s961_s22, %s767_s8, %s767_s8, %s768_s9  }
 0x2d1 PF: > { %p653_p1 = scmp.ge.s32.totalorder %s760_s21, 2  ;;  %s571_s11 = sand.u32 1, %s748_s18  }
 0x2d2   : > { %s572_s12 = scalar_lea.sflag [#allocation3], %s571_s11 }
 0x2d3   : > { %p650_p2 = pnand %p653_p1, %p841_p6 }
 0x2d5   : > { %743 = dma.done.wait (!%p650_p2), %s572_s12, 1024  }
 0x2d6   : > { %745 = vsyncadd (!%p650_p2), %s572_s12, 4294966272  ;;  %p15_p3 = scmp.ge.s32.totalorder %s824_s24, 4   ;;  %s1010_s18 = smov %s752_s19 }
 0x2d7   : > { %s1011_s19 = smov %s756_s20  ;;  %s1012_s20 = smov %s835_s27 }
 0x2d8   : > { %s1013_s21 = smov %s824_s24  ;;  %17 = sbr.rel (!%p15_p3) target bundleno = 3 (0x3), region = 75 }
 0x2df   :  { %577 = vsyncpa [#allocation3], 1 }
 0x2e0   :  { %579 = vsyncpa [#allocation3 + $0x1], 1 }

</bundles_post_ra>
